<compile_context>
chip_gen: v5e
topology: v5e:2x2
jax: 0.10.0
libtpu: 0.0.40
codegen_flags: <defaults>
</compile_context>

<pallas_src>
import functools
import math

import jax
import jax.numpy as jnp
from jax.experimental import pallas as pl
from jax.experimental.pallas import tpu as pltpu

_SQRT_2_OVER_PI = 0.7978845608028654
_GELU_COEF = 0.044715


def _gelu_tanh(h):
    return 0.5 * h * (1.0 + jnp.tanh(_SQRT_2_OVER_PI * (h + _GELU_COEF * h * h * h)))


def _ffn_kernel(x_ref, w1_ref, b1_ref, w2_ref, b2_ref, o_ref, *scratch, n_sub):
    """One (token_block x E) token tile, one ff-dim block.

    x_ref : (T, E)      w1_ref : (E, TF)   b1_ref : (1, TF)
    w2_ref: (TF, E)     b2_ref : (1, E)    o_ref  : (T, E)
    scratch: optional (T, E) f32 accumulator (only when the output dtype is not f32;
             otherwise the VMEM-resident output block itself is the accumulator).
    """
    acc_ref = scratch[0] if scratch else o_ref
    j = pl.program_id(1)

    @pl.when(j == 0)
    def _init():
        acc_ref[...] = jnp.zeros_like(acc_ref)

    x = x_ref[...]
    tf = w1_ref.shape[1]
    sub = tf // n_sub
    # Unrolled sub-chunking over the ff block: matmul1 of chunk c+1 can issue on the MXU
    # while GELU (VPU/EUP) and matmul2 of chunk c are still in flight.
    for c in range(n_sub):
        s = slice(c * sub, (c + 1) * sub)
        h = jnp.dot(x, w1_ref[:, s], preferred_element_type=jnp.float32) + b1_ref[:, s]
        h = _gelu_tanh(h)
        acc_ref[...] += jnp.dot(h.astype(w2_ref.dtype), w2_ref[s, :],
                                preferred_element_type=jnp.float32)

    @pl.when(j == pl.num_programs(1) - 1)
    def _finalize():
        if scratch:
            o_ref[...] = (acc_ref[...] + b2_ref[...]).astype(o_ref.dtype)
        else:
            o_ref[...] = acc_ref[...] + b2_ref[...]


def _round_up(n, m):
    return ((n + m - 1) // m) * m


def _cdiv(a, b):
    return -(-a // b)


def _footprint_bytes(tb, embed, fb, xb, wb, ob, need_scratch):
    """Per-grid-step VMEM estimate (double-buffered inputs/outputs + temporaries)."""
    x_buf = 2 * tb * embed * xb
    w1_buf = 2 * embed * fb * wb
    b1_buf = 2 * 8 * fb * 4
    w2_buf = 2 * fb * embed * wb
    b2_buf = 2 * 8 * embed * 4
    o_buf = 2 * tb * embed * ob
    h_tmp = 2 * tb * fb * 4          # hidden activation + GELU temporaries (f32)
    acc = tb * embed * 4 if need_scratch else 0
    return x_buf + w1_buf + b1_buf + w2_buf + b2_buf + o_buf + h_tmp + acc


def _select_tiles(N, E, F, xb, wb, ob, need_scratch, budget, g, tb_pref):
    """Pick (token_block, ff_block) so the per-step working set fits the VMEM budget."""
    tb = min(_round_up(tb_pref, g), _round_up(N, g))
    # Give the "parallel" token axis >= 2 steps when possible so both TensorCores on a
    # v7x megacore get work even for modest N.
    if N > g and _cdiv(N, tb) < 2:
        tb = _round_up(_cdiv(N, 2), g)

    full_f = _round_up(F, 128)
    while True:
        # Prefer the full (weight-resident) ff block, then descending lane-aligned blocks.
        fb_cands = sorted({full_f} | {c for c in (2048, 1024, 512, 256, 128) if c <= full_f},
                          reverse=True)
        for fb in fb_cands:
            if _footprint_bytes(tb, E, fb, xb, wb, ob, need_scratch) <= budget:
                return tb, fb
        if tb > g:
            tb = max(g, _round_up(tb // 2, g))
        else:
            return tb, 128


def feed_forward_forward(x, w1, b1, w2, b2, *,
                         token_block=512,
                         vmem_budget_bytes=44 * 1024 * 1024,
                         vmem_limit_bytes=56 * 1024 * 1024,
                         compute_dtype=None):
    """x: (B, S, E).  w1: (E, F), b1: (F,), w2: (F, E), b2: (E,).

    Weights are stored TRANSPOSED relative to torch.nn.Linear.weight, i.e. (in, out),
    so every projection is y = x @ W + b.  Pass compute_dtype=jnp.bfloat16 (or bf16
    operands directly) for the MXU-native bf16 path; accumulation stays f32.
    """
    B, S, E = x.shape
    Ein, F = w1.shape
    assert Ein == E and w2.shape == (F, E) and b1.shape == (F,) and b2.shape == (E,)

    if compute_dtype is not None:
        x = x.astype(compute_dtype)
        w1 = w1.astype(compute_dtype)
        w2 = w2.astype(compute_dtype)

    out_dtype = x.dtype
    N = B * S

    xb = jnp.dtype(x.dtype).itemsize
    wb = jnp.dtype(w1.dtype).itemsize
    ob = jnp.dtype(out_dtype).itemsize
    g = 32 // xb                      # sublane granularity: 8 (f32) / 16 (bf16) / 32 (int8)
    need_scratch = jnp.dtype(out_dtype) != jnp.dtype(jnp.float32)

    tb, fb = _select_tiles(N, E, F, xb, wb, ob, need_scratch,
                           vmem_budget_bytes, g, token_block)

    n_pad = _round_up(N, tb)
    f_pad = _round_up(F, fb)

    x2d = x.reshape(N, E)
    if n_pad != N:
        x2d = jnp.pad(x2d, ((0, n_pad - N), (0, 0)))

    if f_pad != F:
        # Exact: padded hidden units are gelu(0)=0 and their W2 rows are 0 -> contribute 0.
        w1 = jnp.pad(w1, ((0, 0), (0, f_pad - F)))
        b1 = jnp.pad(b1, ((0, f_pad - F),))
        w2 = jnp.pad(w2, ((0, f_pad - F), (0, 0)))

    b1r = b1.reshape(1, f_pad)
    b2r = b2.reshape(1, E)

    grid = (n_pad // tb, f_pad // fb)
    n_sub = 2 if fb % 256 == 0 else 1
    scratch_shapes = [pltpu.VMEM((tb, E), jnp.float32)] if need_scratch else []

    cost = pl.CostEstimate(
        flops=4 * N * E * F,
        transcendentals=N * F,
        bytes_accessed=int(N * E * (xb + ob) + 2 * E * F * wb + (F + E) * 4),
    )

    out2d = pl.pallas_call(
        functools.partial(_ffn_kernel, n_sub=n_sub),
        out_shape=jax.ShapeDtypeStruct((n_pad, E), out_dtype),
        grid_spec=pltpu.PrefetchScalarGridSpec(
            num_scalar_prefetch=0,
            grid=grid,
            in_specs=[
                pl.BlockSpec((tb, E), lambda i, j: (i, 0)),   # x token tile
                pl.BlockSpec((E, fb), lambda i, j: (0, j)),   # W1 ff-slab
                pl.BlockSpec((1, fb), lambda i, j: (0, j)),   # b1 ff-slab
                pl.BlockSpec((fb, E), lambda i, j: (j, 0)),   # W2 ff-slab
                pl.BlockSpec((1, E), lambda i, j: (0, 0)),    # b2
            ],
            out_specs=pl.BlockSpec((tb, E), lambda i, j: (i, 0)),
            scratch_shapes=scratch_shapes,
        ),
        compiler_params=pltpu.CompilerParams(
            dimension_semantics=("parallel", "arbitrary"),
            vmem_limit_bytes=int(vmem_limit_bytes),
        ),
        cost_estimate=cost,
    )(x2d, w1, b1r, w2, b2r)

    if n_pad != N:
        out2d = out2d[:N]
    return out2d.reshape(B, S, E)


def feed_forward_ref(x, w1, b1, w2, b2):
    """Pure-JAX mirror of the PyTorch forward (eval mode, tanh-GELU path)."""
    h = x @ w1 + b1
    h = _gelu_tanh(h)
    return h @ w2 + b2


if __name__ == "__main__":
    key = jax.random.PRNGKey(0)
    kx, k1, k2, k3, k4 = jax.random.split(key, 5)

    # Small shapes consistent with the module: (batch=2, seq=8, embed=32), ff_dim=128.
    B, S, E, F = 2, 8, 32, 128

    x = jax.random.normal(kx, (B, S, E), jnp.float32) * 0.5
    w1 = jax.random.normal(k1, (E, F), jnp.float32) * (1.0 / math.sqrt(E))
    b1 = jax.random.normal(k2, (F,), jnp.float32) * 0.01
    w2 = jax.random.normal(k3, (F, E), jnp.float32) * (1.0 / math.sqrt(F))
    b2 = jax.random.normal(k4, (E,), jnp.float32) * 0.01

    ref = feed_forward_ref(x, w1, b1, w2, b2)

    # f32 path (accumulates directly into the VMEM-resident output block).
    out = feed_forward_forward(x, w1, b1, w2, b2)
    out = jax.block_until_ready(out)
    assert out.shape == (B, S, E), out.shape
    max_err = float(jnp.max(jnp.abs(out - ref)))
    assert max_err < 1e-3, f"f32 max abs error vs reference: {max_err}"

    # bf16 MXU-native path (bf16 operands, f32 accumulation, f32 scratch accumulator).
    out_bf16 = feed_forward_forward(x, w1, b1, w2, b2, compute_dtype=jnp.bfloat16)
    out_bf16 = jax.block_until_ready(out_bf16)
    max_err_bf16 = float(jnp.max(jnp.abs(out_bf16.astype(jnp.float32) - ref)))
    assert max_err_bf16 < 1e-1, f"bf16 max abs error vs reference: {max_err_bf16}"

    print("KERNEL_OK")
</pallas_src>

<mosaic_0001>
module attributes {stable_mosaic.version = 11 : i64} {
  func.func @_ffn_kernel(%arg0: i32, %arg1: i32, %arg2: memref<8x32xf32, #tpu.memory_space<vmem>>, %arg3: memref<32x128xf32, #tpu.memory_space<vmem>>, %arg4: memref<1x128xf32, #tpu.memory_space<vmem>>, %arg5: memref<128x32xf32, #tpu.memory_space<vmem>>, %arg6: memref<1x32xf32, #tpu.memory_space<vmem>>, %arg7: memref<8x32xf32, #tpu.memory_space<vmem>>) attributes {dimension_semantics = [#tpu.dimension_semantics<parallel>, #tpu.dimension_semantics<arbitrary>], iteration_bounds = array<i64: 2, 1>, scalar_prefetch = 0 : i64, scratch_operands = 0 : i64, tpu.core_type = #tpu.core_type<tc>, window_params = [{transform_indices = @transform_0, window_bounds = array<i64: 8, 32>}, {transform_indices = @transform_1, window_bounds = array<i64: 32, 128>}, {transform_indices = @transform_2, window_bounds = array<i64: 1, 128>}, {transform_indices = @transform_3, window_bounds = array<i64: 128, 32>}, {pipeline_mode = #tpu.pipeline_mode<synchronous>, transform_indices = @transform_4, window_bounds = array<i64: 1, 32>}, {transform_indices = @transform_5, window_bounds = array<i64: 8, 32>}]} {
    %c0_i32 = arith.constant 0 : i32
    %0 = arith.cmpi eq, %arg1, %c0_i32 : i32
    %1 = arith.extui %0 : i1 to i32
    %c0_i32_0 = arith.constant 0 : i32
    %2 = arith.cmpi ne, %1, %c0_i32_0 : i32
    scf.if %2 {
      %cst_19 = arith.constant 0.000000e+00 : f32
      %30 = vector.broadcast %cst_19 : f32 to vector<8x32xf32>
      %c0_20 = arith.constant 0 : index
      %c0_21 = arith.constant 0 : index
      %31 = vector.load %arg7[%c0_20, %c0_21] : memref<8x32xf32, #tpu.memory_space<vmem>>, vector<8x32xf32>
      tpu.vector_store %arg7[%c0_20, %c0_21], %30 {strides = array<i32>} : memref<8x32xf32, #tpu.memory_space<vmem>>, vector<8x32xf32>,
    } else {
    }
    %c0 = arith.constant 0 : index
    %c0_1 = arith.constant 0 : index
    %3 = vector.load %arg2[%c0, %c0_1] : memref<8x32xf32, #tpu.memory_space<vmem>>, vector<8x32xf32>
    %c0_2 = arith.constant 0 : index
    %c0_3 = arith.constant 0 : index
    %4 = vector.load %arg3[%c0_2, %c0_3] : memref<32x128xf32, #tpu.memory_space<vmem>>, vector<32x128xf32>
    %cst = arith.constant dense<0.000000e+00> : vector<8x128xf32>
    %5 = tpu.matmul %3, %4, %cst {dimension_numbers = #tpu.dot_dimension_numbers<[1], [0], [0], [1], [0, 0, 1, 1], [], []>} : vector<8x32xf32>, vector<32x128xf32>, vector<8x128xf32> -> vector<8x128xf32>
    %c0_4 = arith.constant 0 : index
    %c0_5 = arith.constant 0 : index
    %6 = vector.load %arg4[%c0_4, %c0_5] : memref<1x128xf32, #tpu.memory_space<vmem>>, vector<1x128xf32>
    %7 = vector.broadcast %6 : vector<1x128xf32> to vector<8x128xf32>
    %8 = arith.addf %5, %7 : vector<8x128xf32>
    %cst_6 = arith.constant 5.000000e-01 : f32
    %9 = vector.broadcast %cst_6 : f32 to vector<8x128xf32>
    %10 = arith.mulf %9, %8 : vector<8x128xf32>
    %cst_7 = arith.constant 4.471500e-02 : f32
    %11 = vector.broadcast %cst_7 : f32 to vector<8x128xf32>
    %12 = arith.mulf %11, %8 : vector<8x128xf32>
    %13 = arith.mulf %12, %8 : vector<8x128xf32>
    %14 = arith.mulf %13, %8 : vector<8x128xf32>
    %15 = arith.addf %8, %14 : vector<8x128xf32>
    %cst_8 = arith.constant 0.797884583 : f32
    %16 = vector.broadcast %cst_8 : f32 to vector<8x128xf32>
    %17 = arith.mulf %16, %15 : vector<8x128xf32>
    %18 = math.tanh %17 : vector<8x128xf32>
    %cst_9 = arith.constant 1.000000e+00 : f32
    %19 = vector.broadcast %cst_9 : f32 to vector<8x128xf32>
    %20 = arith.addf %19, %18 : vector<8x128xf32>
    %21 = arith.mulf %10, %20 : vector<8x128xf32>
    %c0_10 = arith.constant 0 : index
    %c0_11 = arith.constant 0 : index
    %22 = vector.load %arg7[%c0_10, %c0_11] : memref<8x32xf32, #tpu.memory_space<vmem>>, vector<8x32xf32>
    %c0_12 = arith.constant 0 : index
    %c0_13 = arith.constant 0 : index
    %23 = vector.load %arg5[%c0_12, %c0_13] : memref<128x32xf32, #tpu.memory_space<vmem>>, vector<128x32xf32>
    %cst_14 = arith.constant dense<0.000000e+00> : vector<8x32xf32>
    %24 = tpu.matmul %21, %23, %cst_14 {dimension_numbers = #tpu.dot_dimension_numbers<[1], [0], [0], [1], [0, 0, 1, 1], [], []>} : vector<8x128xf32>, vector<128x32xf32>, vector<8x32xf32> -> vector<8x32xf32>
    %25 = arith.addf %22, %24 : vector<8x32xf32>
    %c0_15 = arith.constant 0 : index
    %c0_16 = arith.constant 0 : index
    %26 = vector.load %arg7[%c0_15, %c0_16] : memref<8x32xf32, #tpu.memory_space<vmem>>, vector<8x32xf32>
    tpu.vector_store %arg7[%c0_15, %c0_16], %25 {strides = array<i32>} : memref<8x32xf32, #tpu.memory_space<vmem>>, vector<8x32xf32>,
    %c0_i32_17 = arith.constant 0 : i32
    %27 = arith.cmpi eq, %arg1, %c0_i32_17 : i32
    %28 = arith.extui %27 : i1 to i32
    %c0_i32_18 = arith.constant 0 : i32
    %29 = arith.cmpi ne, %28, %c0_i32_18 : i32
    scf.if %29 {
      %c0_19 = arith.constant 0 : index
      %c0_20 = arith.constant 0 : index
      %30 = vector.load %arg7[%c0_19, %c0_20] : memref<8x32xf32, #tpu.memory_space<vmem>>, vector<8x32xf32>
      %c0_21 = arith.constant 0 : index
      %c0_22 = arith.constant 0 : index
      %31 = vector.load %arg6[%c0_21, %c0_22] : memref<1x32xf32, #tpu.memory_space<vmem>>, vector<1x32xf32>
      %32 = vector.broadcast %31 : vector<1x32xf32> to vector<8x32xf32>
      %33 = arith.addf %30, %32 : vector<8x32xf32>
      %c0_23 = arith.constant 0 : index
      %c0_24 = arith.constant 0 : index
      %34 = vector.load %arg7[%c0_23, %c0_24] : memref<8x32xf32, #tpu.memory_space<vmem>>, vector<8x32xf32>
      tpu.vector_store %arg7[%c0_23, %c0_24], %33 {strides = array<i32>} : memref<8x32xf32, #tpu.memory_space<vmem>>, vector<8x32xf32>,
    } else {
    }
    return
  }
  func.func @transform_0(%arg0: i32, %arg1: i32) -> (i32, i32) {
    %c0_i32 = arith.constant 0 : i32
    %c0_i32_0 = arith.constant 0 : i32
    return %arg0, %c0_i32 : i32, i32
  }
  func.func @transform_1(%arg0: i32, %arg1: i32) -> (i32, i32) {
    %c0_i32 = arith.constant 0 : i32
    %c0_i32_0 = arith.constant 0 : i32
    return %c0_i32, %arg1 : i32, i32
  }
  func.func @transform_2(%arg0: i32, %arg1: i32) -> (i32, i32) {
    %c0_i32 = arith.constant 0 : i32
    %c0_i32_0 = arith.constant 0 : i32
    return %c0_i32, %arg1 : i32, i32
  }
  func.func @transform_3(%arg0: i32, %arg1: i32) -> (i32, i32) {
    %c0_i32 = arith.constant 0 : i32
    %c0_i32_0 = arith.constant 0 : i32
    return %arg1, %c0_i32 : i32, i32
  }
  func.func @transform_4(%arg0: i32, %arg1: i32) -> (i32, i32) {
    %c0_i32 = arith.constant 0 : i32
    %c0_i32_0 = arith.constant 0 : i32
    %c0_i32_1 = arith.constant 0 : i32
    return %c0_i32, %c0_i32_0 : i32, i32
  }
  func.func @transform_5(%arg0: i32, %arg1: i32) -> (i32, i32) {
    %c0_i32 = arith.constant 0 : i32
    %c0_i32_0 = arith.constant 0 : i32
    return %arg0, %c0_i32 : i32, i32
  }
}

</mosaic_0001>

<bundles_post_ra>
// kernel: tpu_custom_call.1
= control target key start
LH: loop header
LB: loop body
LE: loop exit
PB: predicated region body
PF: predicated region fallthrough
CT: control target
= control target key end

     0   :  { %10 = vsyncpa [#allocation3], 0  ;;  %s872_s0 = inlined_call_operand.vmem [shape: f32[16,32], index: 0, kind: input, shape index: {}]   ;;  %s873_s1 = inlined_call_operand.vmem [shape: f32[32,128], index: 1, kind: input, shape index: {}]   ;;  %s874_s2 = inlined_call_operand.vmem [shape: f32[1,128], index: 2, kind: input, shape index: {}]   ;;  %s875_s3 = inlined_call_operand.vmem [shape: f32[128,32], index: 3, kind: input, shape index: {}]   ;;  %s876_s4 = inlined_call_operand.vmem [shape: f32[1,32], index: 4, kind: input, shape index: {}]   ;;  %s877_s5 = inlined_call_operand.hbm [shape: f32[16,32], index: 5, kind: output, shape index: {}]  }
   0x1   :  { %12 = vsyncpa [#allocation3 + $0x1], 0  ;;  %s693_s18 = smov 0   ;;  %s695_s19 = smov 0  }
   0x2   :  { %s697_s20 = smov 0   ;;  %s699_s21 = smov 0  }
   0x3   :  { %s701_s22 = smov 0   ;;  %s703_s23 = smov 0  }
   0x4 LB: > { %s507_s24 = sadd.s32 4294967295, %s660_s23   ;;  %s508_s25 = sadd.s32 4294967294, %s660_s23   ;;  %s660_s23 = sphi %s703_s23, %s18_s23   ;;  %s656_s22 = sphi %s701_s22, %s884_s22   ;;  %s652_s21 = sphi %s699_s21, %s883_s21   ;;  %s648_s20 = sphi %s697_s20, %s882_s20   ;;  %s644_s19 = sphi %s695_s19, %s881_s19   ;;  %s640_s18 = sphi %s693_s18, %s880_s18  }
   0x5   : > { %s30_s26 = sadd.s32 1, %s656_s22  ;;  %s162_s27 = sadd.s32 1, %s648_s20 }
   0x6   : > { %p32_p0 = scmp.ge.s32.totalorder %s30_s26, 2  ;;  %p172_p1 = scmp.ne.s32.totalorder %s648_s20, %s644_s19 }
   0x7   : > { %p173_p2 = scmp.eq.s32.totalorder %s507_s24, 1  ;;  %p178_p3 = scmp.ne.s32.totalorder %s644_s19, %s640_s18 }
   0x8   : > { %s886_s26 = smov (%p32_p0, %s30_s26), 0  ;;  %p179_p5 = scmp.eq.s32.totalorder %s508_s25, 1 }
   0x9   : > { %p733_p4 = por %p173_p2, %p172_p1  ;;  %s159_s29 = ssub.s32 %s656_s22, %s886_s26 }
   0xa   : > { %p514_p6 = scmp.ge.s32.totalorder %s660_s23, 1  ;;  %p160_p7 = scmp.eq.s32.totalorder %s159_s29, 0 }
   0xb   : > { %p740_p8 = por %p179_p5, %p178_p3  ;;  %p229_p9 = scmp.lt.s32.totalorder %s660_s23, 3 }
   0xc   : > { %s746_s6 = scalar_select %p160_p7, %s648_s20, %s162_s27  }
   0xd   : > { %p230_p10 = pnand %p514_p6, %p229_p9 }
   0xe   : > { %p268_p11 = scmp.lt.s32.totalorder (!%p230_p10), %s652_s21, 1  ;;  %s265_s24 = sand.u32 (!%p230_p10), 1, %s644_s19  }
   0xf   : > { %233 = sbr.rel (%p230_p10) target bundleno = 318 (0x13e), region = 40  ;;  %s515_s29 = sshll.u32 (!%p230_p10), %s265_s24, 3 }
  0x10   : > { %s817_s9 = scalar_lea.vmem (!%p230_p10), [#allocation2], %s515_s29  ;;  %s519_s12 = sshll.u32 (!%p230_p10), %s652_s21, 3 }
  0x11   : > { %s393_s15 = scalar_lea.hbm (!%p230_p10), %s877_s5, %s519_s12  ;;  %s395_s25 = sshll.u32 (!%p230_p10), %s817_s9, 4  ;;  %s396_s25 = int_to_ptr.vmem [resolvable:$true] %s395_s25 }
  0x12   : > { %s397_s27 = sshll.u32 (!%p230_p10), %s393_s15, 4  ;;  %s602_s11 = scalar_lea.hbm (!%p230_p10), %s877_s5, 16  ;;  %s398_s27 = int_to_ptr.hbm [resolvable:$true] %s397_s27 }
  0x13   : > { %s596_s29 = sshra.s32 (!%p230_p10), %s398_s27, 4  ;;  %s597_s29 = int_to_ptr.hbm [resolvable:$true] %s596_s29 }
  0x14   : > { %v295_v0 = vld [vmem:[%s873_s1 + $0x18] sm:$0xff]  ;;  %v294_v1 = vld [vmem:[%s873_s1 + $0x10] sm:$0xff]  ;;  %v293_v4 = vld [vmem:[%s873_s1 + $0x8] sm:$0xff]  ;;  %s269_s17 = scalar_select %p268_p11, %s652_s21, 1  ;;  %vm289_vm0 = vcmask 261120   ;;  %v662_v21 = vmov 0.0  }
  0x15   : > { %316 = vmatpush.msra.mxu0 %v295_v0  ;;  %v349_v2 = vld [vmem:[%s875_s3 + $0x78] sm:$0xff]  ;;  %v348_v3 = vld [vmem:[%s875_s3 + $0x70] sm:$0xff]  ;;  %v347_v5 = vld [vmem:[%s875_s3 + $0x68] sm:$0xff]  ;;  %290 = vst.msk [vmem:[%s817_s9] sm:$0xff] %vm289_vm0, %v662_v21  ;;  %s383_s21 = scalar_lea.sflag [#allocation3], %s265_s24  ;;  %p603_p1 = scmp.lt.s32.totalorder %s597_s29, %s877_s5 }
  0x16   : > { %350 = vmatpush.msra.mxu1 %v349_v2  ;;  %v292_v6 = vld [vmem:[%s873_s1] sm:$0xff]  ;;  %s516_s7 = sshll.u32 %s269_s17, 3  ;;  %v345_v9 = vld [vmem:[%s875_s3 + $0x58] sm:$0xff]  ;;  %v344_v10 = vld [vmem:[%s875_s3 + $0x50] sm:$0xff] }
  0x17   : > { %317 = vmatpush.msra.mxu0 %v294_v1  ;;  %s271_s10 = scalar_lea.vmem %s872_s0, %s516_s7  ;;  %v346_v7 = vld [vmem:[%s875_s3 + $0x60] sm:$0xff]  ;;  %v343_v11 = vld [vmem:[%s875_s3 + $0x48] sm:$0xff]  ;;  %v341_v13 = vld [vmem:[%s875_s3 + $0x38] sm:$0xff]  ;;  %s598_s7 = scalar_lea.hbm %s597_s29, 8 }
  0x18   : > { %351 = vmatpush.msra.mxu1 %v348_v3  ;;  %v291_v8 = vld [vmem:[%s271_s10] sm:$0xff]  ;;  %v340_v14 = vld [vmem:[%s875_s3 + $0x30] sm:$0xff]  ;;  %v339_v15 = vld [vmem:[%s875_s3 + $0x28] sm:$0xff]  ;;  %p599_p12 = scmp.ne.s32.totalorder %s597_s29, %s598_s7  ;;  %p604_p2 = scmp.lt.s32.totalorder %s602_s11, %s598_s7 }
  0x19   : > { %318 = vmatpush.msra.mxu0 %v293_v4  ;;  %v342_v12 = vld [vmem:[%s875_s3 + $0x40] sm:$0xff]  ;;  %v337_v17 = vld [vmem:[%s875_s3 + $0x18] sm:$0xff]  ;;  %v336_v18 = vld [vmem:[%s875_s3 + $0x10] sm:$0xff] }
  0x1a   : > { %352 = vmatpush.msra.mxu1 %v347_v5  ;;  %v338_v16 = vld [vmem:[%s875_s3 + $0x20] sm:$0xff]  ;;  %v335_v19 = vld [vmem:[%s875_s3 + $0x8] sm:$0xff]  ;;  %p600_p13 = pnand %p599_p12, %p733_p4  ;;  %p605_p3 = por %p604_p2, %p603_p1 }
  0x1b   : > { %319 = vmatpush.msra.mxu0 %v292_v6  ;;  %v334_v20 = vld [vmem:[%s875_s3] sm:$0xff] }
  0x1c   : > { %517 = vmatmul.msk.f32.vlgmr.msra.gmra.mxu0 %vm289_vm0, %v291_v8  ;;  %353 = vmatpush.msra.mxu1 %v346_v7  ;;  %v578_v22 = vld [vmem:[%s874_s2] ss:$0 sm:$0xff]  ;;  %p601_p0 = pneg %p600_p13 }
  0x1d   : > { %v333_v34 = vld [vmem:[%s817_s9] sm:$0xff] }
  0x1e   : > { %354 = vmatpush.msra.mxu1 %v345_v9  ;;  %v579_v37 = vld [vmem:[%s876_s4] ss:$0 sm:$0xff]  ;;  %p606_p5 = pnand %p605_p3, %p601_p0 }
  0x20   : > { %355 = vmatpush.msra.mxu1 %v344_v10 }
  0x22   : > { %356 = vmatpush.msra.mxu1 %v343_v11 }
  0x24   : > { %357 = vmatpush.msra.mxu1 %v342_v12 }
  0x26   : > { %358 = vmatpush.msra.mxu1 %v341_v13 }
  0x28   : > { %359 = vmatpush.msra.mxu1 %v340_v14 }
  0x2a   : > { %360 = vmatpush.msra.mxu1 %v339_v15 }
  0x2c   : > { %361 = vmatpush.msra.mxu1 %v338_v16 }
  0x2e   : > { %362 = vmatpush.msra.mxu1 %v337_v17 }
  0x30   : > { %363 = vmatpush.msra.mxu1 %v336_v18 }
  0x32   : > { %364 = vmatpush.msra.mxu1 %v335_v19 }
  0x34   : > { %365 = vmatpush.msra.mxu1 %v334_v20 }
  0x99   : > { %v321_v23 = vpop.f32.mrf.mxu0 }
  0x9a   : > { %v322_v24 = vadd.f32 %v578_v22, %v321_v23 }
  0x9c   : > { %v325_v25 = vmul.f32 0.044715, %v322_v24  ;;  %v324_v31 = vmul.f32 0.5, %v322_v24 }
  0x9e   : > { %v326_v26 = vmul.f32 %v325_v25, %v322_v24 }
  0xa0   : > { %v327_v27 = vmul.f32 %v326_v26, %v322_v24 }
  0xa2   : > { %v328_v28 = vadd.f32 %v327_v27, %v322_v24 }
  0xa4   : > { %v329_v29 = vmul.f32 0.7978846, %v328_v28 }
  0xa6   : > { %580 = vtanh.f32 %v329_v29 }
  0xac   : > { %v581_v30 = vpop.eup %580 }
  0xad   : > { %v331_v32 = vadd.f32 1.0, %v581_v30 }
  0xaf   : > { %v332_v33 = vmul.f32 %v331_v32, %v324_v31 }
  0xb1   : > { %366 = vmatmul.f32.vlgmr.msra.gmra.mxu1 %v332_v33 }
 0x12e   : > { %v367_v35 = vpop.f32.mrf.mxu1 }
 0x12f   : > { %v370_v36 = vadd.f32 %v367_v35, %v333_v34 }
 0x131   : > { %371 = vst.msk [vmem:[%s817_s9] sm:$0xff] %vm289_vm0, %v370_v36 }
 0x138   : > { %v375_v38 = vld [vmem:[%s817_s9] sm:$0xff] }
 0x139   : > { %v380_v39 = vadd.f32 %v579_v37, %v375_v38 }
 0x13b   : > { %381 = vst.msk [vmem:[%s817_s9] sm:$0xff] %vm289_vm0, %v380_v39 }
 0x13c   : > { %609 = shalt.err (!%p606_p5)
}
 0x13d   : > { %522 = dma.vmem_to_hbm [thread:$0]  (%p733_p4), %s396_s25, 128, %s398_s27, %s383_s21  }
 0x13e PF: > { %p528_p6 = scmp.ge.s32.totalorder %s660_s23, 2  ;;  %s409_s24 = sand.u32 1, %s640_s18  }
 0x13f   : > { %s410_s9 = scalar_lea.sflag [#allocation3], %s409_s24 }
 0x140   : > { %p525_p7 = pnand %p528_p6, %p740_p8 }
 0x142   : > { %p526_p9 = pneg %p525_p7 }
 0x144   : > { %635 = dma.done.wait (%p526_p9), %s410_s9, 128  }
 0x145   : > { %637 = vsyncadd (%p526_p9), %s410_s9, 4294967168  ;;  %s18_s23 = sadd.s32 1, %s660_s23   ;;  %s880_s18 = smov %s644_s19 }
 0x146   : > { %p15_p10 = scmp.ge.s32.totalorder %s18_s23, 4   ;;  %s881_s19 = smov %s648_s20 }
 0x147   : > { %s882_s20 = smov %s746_s6  ;;  %s883_s21 = smov %s656_s22 }
 0x148   : > { %s884_s22 = smov %s886_s26  ;;  %17 = sbr.rel (!%p15_p10) target bundleno = 4 (0x4), region = 92 }
 0x14d   :  { %416 = vsyncpa [#allocation3], 1 }
 0x14e   :  { %418 = vsyncpa [#allocation3 + $0x1], 1 }

</bundles_post_ra>
